<compile_context>
chip_gen: v7x
topology: tpu7x:2x2x1
jax: 0.10.0
libtpu: 0.0.40
codegen_flags: <defaults>
</compile_context>

<pallas_src>
import functools

import jax
import jax.numpy as jnp
from jax.experimental import pallas as pl
from jax.experimental.pallas import tpu as pltpu

LANE = 128
SUBLANE = 16  # multiple of 16 keeps bf16 sublane packing clean


def _round_up(x, m):
    return (x + m - 1) // m * m


# ----------------------------------------------------------------------------
# Kernel
# ----------------------------------------------------------------------------
def vae3_kernel(
    x_ref, eps_ref,
    w1_ref, b1_ref, w2_ref, b2_ref,      # encoder fc1, fc2
    wh_ref, bh_ref,                      # fused encoder heads (mu | sigma)
    wd1_ref, bd1_ref, wd2_ref, bd2_ref,  # decoder fc1, fc2
    wo_ref, bo_ref,                      # decoder out
    recon_ref, head_ref,                 # lane-dense bf16 outputs
    *, packed_head: bool, sig_off: int,
):
    f32 = jnp.float32
    cd = w1_ref.dtype  # MXU compute dtype (bf16); accumulation stays f32

    x = x_ref[...]  # already in compute dtype

    # ----- Encoder -----
    h1 = jnp.dot(x, w1_ref[...], preferred_element_type=f32) + b1_ref[...]
    h1 = jnp.maximum(h1, 0.0)
    h2 = jnp.dot(h1.astype(cd), w2_ref[...], preferred_element_type=f32) + b2_ref[...]
    h2 = jnp.maximum(h2, 0.0)

    # Fused heads: one matmul produces the packed [mu | sigma] slab.
    head = jnp.dot(h2.astype(cd), wh_ref[...], preferred_element_type=f32) + bh_ref[...]

    eps = eps_ref[...].astype(f32)  # bf16 input, f32 elementwise math

    # ----- Reparameterization: z = mu + sigma * eps (f32) -----
    if packed_head:
        # mu in lanes [0, sig_off), sigma in lanes [sig_off, 2*sig_off).
        # Half-width lane rotation (XLU) aligns sigma with mu; eps is zero
        # beyond z_dim so only the real mu lanes pick up sigma*eps.
        sigma_aligned = pltpu.roll(head, shift=sig_off, axis=1)
        z = head + sigma_aligned * eps
        # Lanes >= z_dim of z hold junk; they hit zero rows of the padded
        # decoder fc1 weight and contribute nothing.
    else:
        zw = eps_ref.shape[-1]
        mu = head[:, :zw]             # split at a 128-lane vreg boundary
        sigma = head[:, zw:]
        z = mu + sigma * eps

    # ----- Decoder -----
    d1 = jnp.dot(z.astype(cd), wd1_ref[...], preferred_element_type=f32) + bd1_ref[...]
    d1 = jnp.maximum(d1, 0.0)
    d2 = jnp.dot(d1.astype(cd), wd2_ref[...], preferred_element_type=f32) + bd2_ref[...]
    d2 = jnp.maximum(d2, 0.0)
    recon = jnp.dot(d2.astype(cd), wo_ref[...], preferred_element_type=f32) + bo_ref[...]

    # Cast only at the final stores (bf16 outputs halve writeback bytes).
    recon_ref[...] = recon.astype(recon_ref.dtype)
    head_ref[...] = head.astype(head_ref.dtype)


# ----------------------------------------------------------------------------
# Parameter construction / padding
# ----------------------------------------------------------------------------
def init_linear(key, fan_in, fan_out):
    """Deterministic init mimicking nn.Linear (uniform +/- 1/sqrt(fan_in)).
    Returns W of shape (fan_in, fan_out) and b of shape (1, fan_out)."""
    kw, kb = jax.random.split(key)
    bound = 1.0 / (fan_in ** 0.5)
    w = jax.random.uniform(kw, (fan_in, fan_out), jnp.float32, -bound, bound)
    b = jax.random.uniform(kb, (1, fan_out), jnp.float32, -bound, bound)
    return w, b


def make_params(key, input_dim, z_dim, h_dim1, h_dim2):
    keys = jax.random.split(key, 7)
    p = {}
    # Encoder: input_dim -> h1 -> h2 -> (z, z)
    p["enc_w1"], p["enc_b1"] = init_linear(keys[0], input_dim, h_dim1)
    p["enc_w2"], p["enc_b2"] = init_linear(keys[1], h_dim1, h_dim2)
    p["enc_wmu"], p["enc_bmu"] = init_linear(keys[2], h_dim2, z_dim)
    p["enc_wsg"], p["enc_bsg"] = init_linear(keys[3], h_dim2, z_dim)
    # Decoder: z -> h1 -> h2 -> input_dim
    p["dec_w1"], p["dec_b1"] = init_linear(keys[4], z_dim, h_dim1)
    p["dec_w2"], p["dec_b2"] = init_linear(keys[5], h_dim1, h_dim2)
    p["dec_wo"], p["dec_bo"] = init_linear(keys[6], h_dim2, input_dim)
    return p


def _pad2(a, rows, cols):
    return jnp.pad(a, ((0, rows - a.shape[0]), (0, cols - a.shape[1])))


def prepare_params(params, input_dim, z_dim, h_dim1, h_dim2,
                   compute_dtype=jnp.bfloat16):
    """Zero-pad all feature dims to multiples of 128, fuse the mu/sigma heads
    (packed into a single 128-lane block when 2*z_dim <= 128), and cast weights
    to the MXU compute dtype (biases stay f32)."""
    IN_P = _round_up(input_dim, LANE)
    H1_P = _round_up(h_dim1, LANE)
    H2_P = _round_up(h_dim2, LANE)
    Z_P = _round_up(z_dim, LANE)
    cd = compute_dtype

    packed = (2 * z_dim) <= LANE
    if packed:
        HEAD_P = LANE          # single 128-lane head block
        SIG_OFF = LANE // 2    # sigma starts at lane 64
        ZW = HEAD_P            # eps / z width inside the kernel
    else:
        HEAD_P = 2 * Z_P       # [mu | sigma] at a vreg boundary
        SIG_OFF = Z_P
        ZW = Z_P

    p = {}
    p["enc_w1"] = _pad2(params["enc_w1"], IN_P, H1_P).astype(cd)
    p["enc_b1"] = _pad2(params["enc_b1"], 1, H1_P)
    p["enc_w2"] = _pad2(params["enc_w2"], H1_P, H2_P).astype(cd)
    p["enc_b2"] = _pad2(params["enc_b2"], 1, H2_P)

    # Fused heads: cols [0:z_dim) = mu, [SIG_OFF:SIG_OFF+z_dim) = sigma.
    wh = jnp.zeros((H2_P, HEAD_P), jnp.float32)
    wh = wh.at[:h_dim2, :z_dim].set(params["enc_wmu"])
    wh = wh.at[:h_dim2, SIG_OFF:SIG_OFF + z_dim].set(params["enc_wsg"])
    bh = jnp.zeros((1, HEAD_P), jnp.float32)
    bh = bh.at[:, :z_dim].set(params["enc_bmu"])
    bh = bh.at[:, SIG_OFF:SIG_OFF + z_dim].set(params["enc_bsg"])
    p["enc_wh"] = wh.astype(cd)
    p["enc_bh"] = bh

    # Decoder fc1 padded so rows >= z_dim are zero (nulls the junk lanes of the
    # packed z vector).
    p["dec_w1"] = _pad2(params["dec_w1"], ZW, H1_P).astype(cd)
    p["dec_b1"] = _pad2(params["dec_b1"], 1, H1_P)
    p["dec_w2"] = _pad2(params["dec_w2"], H1_P, H2_P).astype(cd)
    p["dec_b2"] = _pad2(params["dec_b2"], 1, H2_P)
    p["dec_wo"] = _pad2(params["dec_wo"], H2_P, IN_P).astype(cd)
    p["dec_bo"] = _pad2(params["dec_bo"], 1, IN_P)

    dims = dict(IN_P=IN_P, H1_P=H1_P, H2_P=H2_P, Z_P=Z_P,
                HEAD_P=HEAD_P, SIG_OFF=SIG_OFF, ZW=ZW, packed=packed,
                input_dim=input_dim, z_dim=z_dim)
    return p, dims


# ----------------------------------------------------------------------------
# Wrapper
# ----------------------------------------------------------------------------
def vae3_forward(x, eps, padded_params, dims, *,
                 batch_tile=512, compute_dtype=jnp.bfloat16,
                 slice_outputs=True):
    """x: (B, input_dim) f32, eps: (B, z_dim) f32.
    Returns (recon, mu, sigma) in bf16 (sliced), or the padded/packed
    (recon_p, head_p) slabs when slice_outputs=False."""
    B = x.shape[0]
    IN_P, H1_P, H2_P = dims["IN_P"], dims["H1_P"], dims["H2_P"]
    HEAD_P, SIG_OFF, ZW = dims["HEAD_P"], dims["SIG_OFF"], dims["ZW"]
    input_dim, z_dim = dims["input_dim"], dims["z_dim"]
    packed = dims["packed"]

    # Batch tiling: big tiles amortize per-step overhead, but guarantee >= 2
    # grid steps when the batch allows so "parallel" engages both TCs on v7x.
    TB = min(batch_tile, _round_up(B, SUBLANE))
    if B > SUBLANE and _round_up(B, TB) // TB < 2:
        TB = _round_up(-(-B // 2), SUBLANE)
    B_P = _round_up(B, TB)
    nb = B_P // TB

    # Layout plumbing: cast to bf16 first, pad only when needed (jnp.pad,
    # no full zero-buffer materialization).
    x_c = x.astype(compute_dtype)
    if x_c.shape != (B_P, IN_P):
        x_c = jnp.pad(x_c, ((0, B_P - B), (0, IN_P - input_dim)))
    eps_c = eps.astype(compute_dtype)
    if eps_c.shape != (B_P, ZW):
        eps_c = jnp.pad(eps_c, ((0, B_P - B), (0, ZW - z_dim)))

    p = padded_params
    weights = (p["enc_w1"], p["enc_b1"], p["enc_w2"], p["enc_b2"],
               p["enc_wh"], p["enc_bh"],
               p["dec_w1"], p["dec_b1"], p["dec_w2"], p["dec_b2"],
               p["dec_wo"], p["dec_bo"])

    def batch_spec(cols):
        return pl.BlockSpec((TB, cols), lambda i: (i, 0))

    def resident_spec(a):
        # Constant index_map -> weights stay VMEM-resident across grid steps;
        # single-buffered so the pipeliner doesn't allocate 2x for them.
        try:
            return pl.BlockSpec(a.shape, lambda i: (0, 0),
                                pipeline_mode=pl.Buffered(1))
        except (TypeError, AttributeError):
            return pl.BlockSpec(a.shape, lambda i: (0, 0))

    in_specs = [batch_spec(IN_P), batch_spec(ZW)] + [resident_spec(w) for w in weights]
    out_specs = (batch_spec(IN_P), batch_spec(HEAD_P))
    out_dtype = jnp.bfloat16  # f32 accumulation is kept inside the kernel
    out_shape = (
        jax.ShapeDtypeStruct((B_P, IN_P), out_dtype),      # recon (padded)
        jax.ShapeDtypeStruct((B_P, HEAD_P), out_dtype),    # packed [mu|sigma]
    )

    # Advisory cost estimate for XLA's scheduler.
    flops = 2 * B_P * (IN_P * H1_P + H1_P * H2_P + H2_P * HEAD_P
                       + ZW * H1_P + H1_P * H2_P + H2_P * IN_P)
    weight_bytes = sum(int(w.size) * jnp.dtype(w.dtype).itemsize for w in weights)
    io_bytes = (int(x_c.size) * jnp.dtype(compute_dtype).itemsize
                + int(eps_c.size) * jnp.dtype(compute_dtype).itemsize
                + B_P * IN_P * 2 + B_P * HEAD_P * 2)
    cost = pl.CostEstimate(flops=int(flops), transcendentals=0,
                           bytes_accessed=int(weight_bytes + io_bytes))

    # VMEM budget: single-buffered resident weights + double-buffered I/O
    # tiles + headroom, capped at 75% of this generation's physical VMEM.
    itm = jnp.dtype(compute_dtype).itemsize
    tile_bytes = (TB * IN_P * itm + TB * ZW * itm       # input tiles (bf16)
                  + TB * IN_P * 2 + TB * HEAD_P * 2)    # output tiles (bf16)
    vmem_needed = weight_bytes + 2 * tile_bytes + (4 << 20)
    try:
        vmem_cap = int(pltpu.get_tpu_info().vmem_capacity_bytes)
    except Exception:
        vmem_cap = 64 << 20  # most conservative physical VMEM (v7x per-core)
    vmem_limit = int(max(min(vmem_needed, (3 * vmem_cap) // 4), 16 << 20))

    kernel = functools.partial(vae3_kernel, packed_head=packed, sig_off=SIG_OFF)

    recon_p, head_p = pl.pallas_call(
        kernel,
        out_shape=out_shape,
        grid_spec=pltpu.PrefetchScalarGridSpec(
            num_scalar_prefetch=0,
            grid=(nb,),
            in_specs=in_specs,
            out_specs=out_specs,
        ),
        compiler_params=pltpu.CompilerParams(
            dimension_semantics=("parallel",),   # batch axis: 2 TCs on v7x
            vmem_limit_bytes=vmem_limit,
        ),
        cost_estimate=cost,
    )(x_c, eps_c, *weights)

    if not slice_outputs:
        # Padded layouts: mu = head_p[:, :z_dim], sigma = head_p[:, SIG_OFF:SIG_OFF+z_dim]
        return recon_p, head_p

    recon = recon_p[:B, :input_dim]
    mu = head_p[:B, :z_dim]
    sigma = head_p[:B, SIG_OFF:SIG_OFF + z_dim]
    return recon, mu, sigma


# ----------------------------------------------------------------------------
# References
# ----------------------------------------------------------------------------
def reference_forward(x, eps, p, compute_dtype=jnp.float32):
    """Pure-JAX reference.  With compute_dtype=bf16 it mirrors the kernel's
    mixed-precision path (bf16 MXU inputs + bf16 eps, f32 accumulation)."""
    cd = compute_dtype

    def lin(h, w, b):
        return jnp.dot(h.astype(cd), w.astype(cd),
                       preferred_element_type=jnp.float32) + b

    relu = lambda v: jnp.maximum(v, 0.0)
    h = relu(lin(x, p["enc_w1"], p["enc_b1"]))
    h = relu(lin(h, p["enc_w2"], p["enc_b2"]))
    mu = lin(h, p["enc_wmu"], p["enc_bmu"])
    sigma = lin(h, p["enc_wsg"], p["enc_bsg"])
    eps_c = eps.astype(cd).astype(jnp.float32)
    z = mu + sigma * eps_c
    d = relu(lin(z, p["dec_w1"], p["dec_b1"]))
    d = relu(lin(d, p["dec_w2"], p["dec_b2"]))
    recon = lin(d, p["dec_wo"], p["dec_bo"])
    return recon, mu, sigma


# ----------------------------------------------------------------------------
if __name__ == "__main__":
    compute_dtype = jnp.bfloat16

    def run_case(tag, case_idx, batch, input_dim, z_dim, h_dim1, h_dim2):
        key = jax.random.fold_in(jax.random.PRNGKey(0), case_idx)
        kx, keps, kp = jax.random.split(key, 3)

        x = jax.random.normal(kx, (batch, input_dim), jnp.float32)
        # torch.randn_like noise drawn in plain JAX and fed to the kernel.
        eps = jax.random.normal(keps, (batch, z_dim), jnp.float32)
        params = make_params(kp, input_dim, z_dim, h_dim1, h_dim2)

        padded_params, dims = prepare_params(
            params, input_dim, z_dim, h_dim1, h_dim2, compute_dtype)

        recon, mu, sigma = vae3_forward(x, eps, padded_params, dims,
                                        compute_dtype=compute_dtype)
        jax.block_until_ready((recon, mu, sigma))
        recon = recon.astype(jnp.float32)
        mu = mu.astype(jnp.float32)
        sigma = sigma.astype(jnp.float32)

        # Tight check vs a reference using the same bf16/f32 mixed path
        # (tolerance loosened for the bf16 output rounding).
        r_m, mu_m, sg_m = reference_forward(x, eps, params, compute_dtype=compute_dtype)
        assert jnp.allclose(recon, r_m, atol=2e-2, rtol=2e-2), tag
        assert jnp.allclose(mu, mu_m, atol=2e-2, rtol=2e-2), tag
        assert jnp.allclose(sigma, sg_m, atol=2e-2, rtol=2e-2), tag

        # Loose check vs full-f32 module semantics (bf16 rounding only).
        r_f, mu_f, sg_f = reference_forward(x, eps, params, compute_dtype=jnp.float32)
        assert jnp.allclose(recon, r_f, atol=8e-2, rtol=8e-2), tag
        assert jnp.allclose(mu, mu_f, atol=8e-2, rtol=8e-2), tag
        assert jnp.allclose(sigma, sg_f, atol=8e-2, rtol=8e-2), tag

    # Packed-head path (2*z_dim <= 128), single grid step.
    run_case("packed", 0, batch=8, input_dim=32, z_dim=16, h_dim1=64, h_dim2=32)
    # Unpacked-head path (2*z_dim > 128), >= 2 grid steps (both TCs on v7x).
    run_case("unpacked", 1, batch=40, input_dim=50, z_dim=80, h_dim1=70, h_dim2=60)

    # TODO(synk): combo_elbo/loss (training-time ELBO) is not part of forward()
    # and is not implemented as a kernel.
    print("KERNEL_OK")
</pallas_src>

<mosaic_0001>
module attributes {stable_mosaic.version = 11 : i64} {
  func.func @vae3_kernel(%arg0: i32, %arg1: memref<16x128xbf16, #tpu.memory_space<vmem>>, %arg2: memref<16x128xbf16, #tpu.memory_space<vmem>>, %arg3: memref<128x128xbf16, #tpu.memory_space<vmem>>, %arg4: memref<1x128xf32, #tpu.memory_space<vmem>>, %arg5: memref<128x128xbf16, #tpu.memory_space<vmem>>, %arg6: memref<1x128xf32, #tpu.memory_space<vmem>>, %arg7: memref<128x128xbf16, #tpu.memory_space<vmem>>, %arg8: memref<1x128xf32, #tpu.memory_space<vmem>>, %arg9: memref<128x128xbf16, #tpu.memory_space<vmem>>, %arg10: memref<1x128xf32, #tpu.memory_space<vmem>>, %arg11: memref<128x128xbf16, #tpu.memory_space<vmem>>, %arg12: memref<1x128xf32, #tpu.memory_space<vmem>>, %arg13: memref<128x128xbf16, #tpu.memory_space<vmem>>, %arg14: memref<1x128xf32, #tpu.memory_space<vmem>>, %arg15: memref<16x128xbf16, #tpu.memory_space<vmem>>, %arg16: memref<16x128xbf16, #tpu.memory_space<vmem>>) attributes {dimension_semantics = [#tpu.dimension_semantics<parallel>], iteration_bounds = array<i64: 1>, scalar_prefetch = 0 : i64, scratch_operands = 0 : i64, tpu.core_type = #tpu.core_type<tc>, window_params = [{transform_indices = @transform_0, window_bounds = array<i64: 16, 128>}, {transform_indices = @transform_1, window_bounds = array<i64: 16, 128>}, {pipeline_mode = #tpu.pipeline_mode<synchronous>, transform_indices = @transform_2, window_bounds = array<i64: 128, 128>}, {pipeline_mode = #tpu.pipeline_mode<synchronous>, transform_indices = @transform_3, window_bounds = array<i64: 1, 128>}, {pipeline_mode = #tpu.pipeline_mode<synchronous>, transform_indices = @transform_4, window_bounds = array<i64: 128, 128>}, {pipeline_mode = #tpu.pipeline_mode<synchronous>, transform_indices = @transform_5, window_bounds = array<i64: 1, 128>}, {pipeline_mode = #tpu.pipeline_mode<synchronous>, transform_indices = @transform_6, window_bounds = array<i64: 128, 128>}, {pipeline_mode = #tpu.pipeline_mode<synchronous>, transform_indices = @transform_7, window_bounds = array<i64: 1, 128>}, {pipeline_mode = #tpu.pipeline_mode<synchronous>, transform_indices = @transform_8, window_bounds = array<i64: 128, 128>}, {pipeline_mode = #tpu.pipeline_mode<synchronous>, transform_indices = @transform_9, window_bounds = array<i64: 1, 128>}, {pipeline_mode = #tpu.pipeline_mode<synchronous>, transform_indices = @transform_10, window_bounds = array<i64: 128, 128>}, {pipeline_mode = #tpu.pipeline_mode<synchronous>, transform_indices = @transform_11, window_bounds = array<i64: 1, 128>}, {pipeline_mode = #tpu.pipeline_mode<synchronous>, transform_indices = @transform_12, window_bounds = array<i64: 128, 128>}, {pipeline_mode = #tpu.pipeline_mode<synchronous>, transform_indices = @transform_13, window_bounds = array<i64: 1, 128>}, {transform_indices = @transform_14, window_bounds = array<i64: 16, 128>}, {transform_indices = @transform_15, window_bounds = array<i64: 16, 128>}]} {
    %c0 = arith.constant 0 : index
    %c0_0 = arith.constant 0 : index
    %0 = vector.load %arg1[%c0, %c0_0] : memref<16x128xbf16, #tpu.memory_space<vmem>>, vector<16x128xbf16>
    %c0_1 = arith.constant 0 : index
    %c0_2 = arith.constant 0 : index
    %1 = vector.load %arg3[%c0_1, %c0_2] : memref<128x128xbf16, #tpu.memory_space<vmem>>, vector<128x128xbf16>
    %cst = arith.constant dense<0.000000e+00> : vector<16x128xf32>
    %2 = tpu.matmul %0, %1, %cst {dimension_numbers = #tpu.dot_dimension_numbers<[1], [0], [0], [1], [0, 0, 1, 1], [], []>} : vector<16x128xbf16>, vector<128x128xbf16>, vector<16x128xf32> -> vector<16x128xf32>
    %c0_3 = arith.constant 0 : index
    %c0_4 = arith.constant 0 : index
    %3 = vector.load %arg4[%c0_3, %c0_4] : memref<1x128xf32, #tpu.memory_space<vmem>>, vector<1x128xf32>
    %4 = vector.broadcast %3 : vector<1x128xf32> to vector<16x128xf32>
    %5 = arith.addf %2, %4 : vector<16x128xf32>
    %cst_5 = arith.constant 0.000000e+00 : f32
    %6 = vector.broadcast %cst_5 : f32 to vector<16x128xf32>
    %7 = arith.maximumf %5, %6 : vector<16x128xf32>
    %8 = arith.truncf %7 : vector<16x128xf32> to vector<16x128xbf16>
    %c0_6 = arith.constant 0 : index
    %c0_7 = arith.constant 0 : index
    %9 = vector.load %arg5[%c0_6, %c0_7] : memref<128x128xbf16, #tpu.memory_space<vmem>>, vector<128x128xbf16>
    %cst_8 = arith.constant dense<0.000000e+00> : vector<16x128xf32>
    %10 = tpu.matmul %8, %9, %cst_8 {dimension_numbers = #tpu.dot_dimension_numbers<[1], [0], [0], [1], [0, 0, 1, 1], [], []>} : vector<16x128xbf16>, vector<128x128xbf16>, vector<16x128xf32> -> vector<16x128xf32>
    %c0_9 = arith.constant 0 : index
    %c0_10 = arith.constant 0 : index
    %11 = vector.load %arg6[%c0_9, %c0_10] : memref<1x128xf32, #tpu.memory_space<vmem>>, vector<1x128xf32>
    %12 = vector.broadcast %11 : vector<1x128xf32> to vector<16x128xf32>
    %13 = arith.addf %10, %12 : vector<16x128xf32>
    %cst_11 = arith.constant 0.000000e+00 : f32
    %14 = vector.broadcast %cst_11 : f32 to vector<16x128xf32>
    %15 = arith.maximumf %13, %14 : vector<16x128xf32>
    %16 = arith.truncf %15 : vector<16x128xf32> to vector<16x128xbf16>
    %c0_12 = arith.constant 0 : index
    %c0_13 = arith.constant 0 : index
    %17 = vector.load %arg7[%c0_12, %c0_13] : memref<128x128xbf16, #tpu.memory_space<vmem>>, vector<128x128xbf16>
    %cst_14 = arith.constant dense<0.000000e+00> : vector<16x128xf32>
    %18 = tpu.matmul %16, %17, %cst_14 {dimension_numbers = #tpu.dot_dimension_numbers<[1], [0], [0], [1], [0, 0, 1, 1], [], []>} : vector<16x128xbf16>, vector<128x128xbf16>, vector<16x128xf32> -> vector<16x128xf32>
    %c0_15 = arith.constant 0 : index
    %c0_16 = arith.constant 0 : index
    %19 = vector.load %arg8[%c0_15, %c0_16] : memref<1x128xf32, #tpu.memory_space<vmem>>, vector<1x128xf32>
    %20 = vector.broadcast %19 : vector<1x128xf32> to vector<16x128xf32>
    %21 = arith.addf %18, %20 : vector<16x128xf32>
    %c0_17 = arith.constant 0 : index
    %c0_18 = arith.constant 0 : index
    %22 = vector.load %arg2[%c0_17, %c0_18] : memref<16x128xbf16, #tpu.memory_space<vmem>>, vector<16x128xbf16>
    %23 = arith.extf %22 : vector<16x128xbf16> to vector<16x128xf32>
    %c64_i32 = arith.constant 64 : i32
    %24 = tpu.dynamic_rotate %21 by %c64_i32 dim 1 : vector<16x128xf32>, i32 -> vector<16x128xf32>
    %25 = arith.mulf %24, %23 : vector<16x128xf32>
    %26 = arith.addf %21, %25 : vector<16x128xf32>
    %27 = arith.truncf %26 : vector<16x128xf32> to vector<16x128xbf16>
    %c0_19 = arith.constant 0 : index
    %c0_20 = arith.constant 0 : index
    %28 = vector.load %arg9[%c0_19, %c0_20] : memref<128x128xbf16, #tpu.memory_space<vmem>>, vector<128x128xbf16>
    %cst_21 = arith.constant dense<0.000000e+00> : vector<16x128xf32>
    %29 = tpu.matmul %27, %28, %cst_21 {dimension_numbers = #tpu.dot_dimension_numbers<[1], [0], [0], [1], [0, 0, 1, 1], [], []>} : vector<16x128xbf16>, vector<128x128xbf16>, vector<16x128xf32> -> vector<16x128xf32>
    %c0_22 = arith.constant 0 : index
    %c0_23 = arith.constant 0 : index
    %30 = vector.load %arg10[%c0_22, %c0_23] : memref<1x128xf32, #tpu.memory_space<vmem>>, vector<1x128xf32>
    %31 = vector.broadcast %30 : vector<1x128xf32> to vector<16x128xf32>
    %32 = arith.addf %29, %31 : vector<16x128xf32>
    %cst_24 = arith.constant 0.000000e+00 : f32
    %33 = vector.broadcast %cst_24 : f32 to vector<16x128xf32>
    %34 = arith.maximumf %32, %33 : vector<16x128xf32>
    %35 = arith.truncf %34 : vector<16x128xf32> to vector<16x128xbf16>
    %c0_25 = arith.constant 0 : index
    %c0_26 = arith.constant 0 : index
    %36 = vector.load %arg11[%c0_25, %c0_26] : memref<128x128xbf16, #tpu.memory_space<vmem>>, vector<128x128xbf16>
    %cst_27 = arith.constant dense<0.000000e+00> : vector<16x128xf32>
    %37 = tpu.matmul %35, %36, %cst_27 {dimension_numbers = #tpu.dot_dimension_numbers<[1], [0], [0], [1], [0, 0, 1, 1], [], []>} : vector<16x128xbf16>, vector<128x128xbf16>, vector<16x128xf32> -> vector<16x128xf32>
    %c0_28 = arith.constant 0 : index
    %c0_29 = arith.constant 0 : index
    %38 = vector.load %arg12[%c0_28, %c0_29] : memref<1x128xf32, #tpu.memory_space<vmem>>, vector<1x128xf32>
    %39 = vector.broadcast %38 : vector<1x128xf32> to vector<16x128xf32>
    %40 = arith.addf %37, %39 : vector<16x128xf32>
    %cst_30 = arith.constant 0.000000e+00 : f32
    %41 = vector.broadcast %cst_30 : f32 to vector<16x128xf32>
    %42 = arith.maximumf %40, %41 : vector<16x128xf32>
    %43 = arith.truncf %42 : vector<16x128xf32> to vector<16x128xbf16>
    %c0_31 = arith.constant 0 : index
    %c0_32 = arith.constant 0 : index
    %44 = vector.load %arg13[%c0_31, %c0_32] : memref<128x128xbf16, #tpu.memory_space<vmem>>, vector<128x128xbf16>
    %cst_33 = arith.constant dense<0.000000e+00> : vector<16x128xf32>
    %45 = tpu.matmul %43, %44, %cst_33 {dimension_numbers = #tpu.dot_dimension_numbers<[1], [0], [0], [1], [0, 0, 1, 1], [], []>} : vector<16x128xbf16>, vector<128x128xbf16>, vector<16x128xf32> -> vector<16x128xf32>
    %c0_34 = arith.constant 0 : index
    %c0_35 = arith.constant 0 : index
    %46 = vector.load %arg14[%c0_34, %c0_35] : memref<1x128xf32, #tpu.memory_space<vmem>>, vector<1x128xf32>
    %47 = vector.broadcast %46 : vector<1x128xf32> to vector<16x128xf32>
    %48 = arith.addf %45, %47 : vector<16x128xf32>
    %49 = arith.truncf %48 : vector<16x128xf32> to vector<16x128xbf16>
    %c0_36 = arith.constant 0 : index
    %c0_37 = arith.constant 0 : index
    %50 = vector.load %arg15[%c0_36, %c0_37] : memref<16x128xbf16, #tpu.memory_space<vmem>>, vector<16x128xbf16>
    tpu.vector_store %arg15[%c0_36, %c0_37], %49 {strides = array<i32>} : memref<16x128xbf16, #tpu.memory_space<vmem>>, vector<16x128xbf16>,
    %51 = arith.truncf %21 : vector<16x128xf32> to vector<16x128xbf16>
    %c0_38 = arith.constant 0 : index
    %c0_39 = arith.constant 0 : index
    %52 = vector.load %arg16[%c0_38, %c0_39] : memref<16x128xbf16, #tpu.memory_space<vmem>>, vector<16x128xbf16>
    tpu.vector_store %arg16[%c0_38, %c0_39], %51 {strides = array<i32>} : memref<16x128xbf16, #tpu.memory_space<vmem>>, vector<16x128xbf16>,
    return
  }
  func.func @transform_0(%arg0: i32) -> (i32, i32) {
    %c0_i32 = arith.constant 0 : i32
    %c0_i32_0 = arith.constant 0 : i32
    return %arg0, %c0_i32 : i32, i32
  }
  func.func @transform_1(%arg0: i32) -> (i32, i32) {
    %c0_i32 = arith.constant 0 : i32
    %c0_i32_0 = arith.constant 0 : i32
    return %arg0, %c0_i32 : i32, i32
  }
  func.func @transform_2(%arg0: i32) -> (i32, i32) {
    %c0_i32 = arith.constant 0 : i32
    %c0_i32_0 = arith.constant 0 : i32
    %c0_i32_1 = arith.constant 0 : i32
    return %c0_i32, %c0_i32_0 : i32, i32
  }
  func.func @transform_3(%arg0: i32) -> (i32, i32) {
    %c0_i32 = arith.constant 0 : i32
    %c0_i32_0 = arith.constant 0 : i32
    %c0_i32_1 = arith.constant 0 : i32
    return %c0_i32, %c0_i32_0 : i32, i32
  }
  func.func @transform_4(%arg0: i32) -> (i32, i32) {
    %c0_i32 = arith.constant 0 : i32
    %c0_i32_0 = arith.constant 0 : i32
    %c0_i32_1 = arith.constant 0 : i32
    return %c0_i32, %c0_i32_0 : i32, i32
  }
  func.func @transform_5(%arg0: i32) -> (i32, i32) {
    %c0_i32 = arith.constant 0 : i32
    %c0_i32_0 = arith.constant 0 : i32
    %c0_i32_1 = arith.constant 0 : i32
    return %c0_i32, %c0_i32_0 : i32, i32
  }
  func.func @transform_6(%arg0: i32) -> (i32, i32) {
    %c0_i32 = arith.constant 0 : i32
    %c0_i32_0 = arith.constant 0 : i32
    %c0_i32_1 = arith.constant 0 : i32
    return %c0_i32, %c0_i32_0 : i32, i32
  }
  func.func @transform_7(%arg0: i32) -> (i32, i32) {
    %c0_i32 = arith.constant 0 : i32
    %c0_i32_0 = arith.constant 0 : i32
    %c0_i32_1 = arith.constant 0 : i32
    return %c0_i32, %c0_i32_0 : i32, i32
  }
  func.func @transform_8(%arg0: i32) -> (i32, i32) {
    %c0_i32 = arith.constant 0 : i32
    %c0_i32_0 = arith.constant 0 : i32
    %c0_i32_1 = arith.constant 0 : i32
    return %c0_i32, %c0_i32_0 : i32, i32
  }
  func.func @transform_9(%arg0: i32) -> (i32, i32) {
    %c0_i32 = arith.constant 0 : i32
    %c0_i32_0 = arith.constant 0 : i32
    %c0_i32_1 = arith.constant 0 : i32
    return %c0_i32, %c0_i32_0 : i32, i32
  }
  func.func @transform_10(%arg0: i32) -> (i32, i32) {
    %c0_i32 = arith.constant 0 : i32
    %c0_i32_0 = arith.constant 0 : i32
    %c0_i32_1 = arith.constant 0 : i32
    return %c0_i32, %c0_i32_0 : i32, i32
  }
  func.func @transform_11(%arg0: i32) -> (i32, i32) {
    %c0_i32 = arith.constant 0 : i32
    %c0_i32_0 = arith.constant 0 : i32
    %c0_i32_1 = arith.constant 0 : i32
    return %c0_i32, %c0_i32_0 : i32, i32
  }
  func.func @transform_12(%arg0: i32) -> (i32, i32) {
    %c0_i32 = arith.constant 0 : i32
    %c0_i32_0 = arith.constant 0 : i32
    %c0_i32_1 = arith.constant 0 : i32
    return %c0_i32, %c0_i32_0 : i32, i32
  }
  func.func @transform_13(%arg0: i32) -> (i32, i32) {
    %c0_i32 = arith.constant 0 : i32
    %c0_i32_0 = arith.constant 0 : i32
    %c0_i32_1 = arith.constant 0 : i32
    return %c0_i32, %c0_i32_0 : i32, i32
  }
  func.func @transform_14(%arg0: i32) -> (i32, i32) {
    %c0_i32 = arith.constant 0 : i32
    %c0_i32_0 = arith.constant 0 : i32
    return %arg0, %c0_i32 : i32, i32
  }
  func.func @transform_15(%arg0: i32) -> (i32, i32) {
    %c0_i32 = arith.constant 0 : i32
    %c0_i32_0 = arith.constant 0 : i32
    return %arg0, %c0_i32 : i32, i32
  }
}

</mosaic_0001>

<bundles_post_ra>
// kernel: tpu_custom_call.1
= control target key start
LH: loop header
LB: loop body
LE: loop exit
PB: predicated region body
PF: predicated region fallthrough
CT: control target
= control target key end

     0   :  { %21 = vsyncpa [#allocation3], 0  ;;  %s1823_s0 = inlined_call_operand.hbm [shape: bf16[16,128], index: 0, kind: input, shape index: {}]   ;;  %s1824_s1 = inlined_call_operand.hbm [shape: bf16[16,128], index: 1, kind: input, shape index: {}]   ;;  %s1825_s2 = inlined_call_operand.hbm [shape: bf16[128,128], index: 2, kind: input, shape index: {}]   ;;  %s1826_s3 = inlined_call_operand.vmem [shape: f32[1,128], index: 3, kind: input, shape index: {}]   ;;  %s1827_s4 = inlined_call_operand.hbm [shape: bf16[128,128], index: 4, kind: input, shape index: {}]   ;;  %s1828_s5 = inlined_call_operand.vmem [shape: f32[1,128], index: 5, kind: input, shape index: {}]   ;;  %s1829_s6 = inlined_call_operand.hbm [shape: bf16[128,128], index: 6, kind: input, shape index: {}]   ;;  %s1830_s7 = inlined_call_operand.vmem [shape: f32[1,128], index: 7, kind: input, shape index: {}]   ;;  %s1831_s8 = inlined_call_operand.hbm [shape: bf16[128,128], index: 8, kind: input, shape index: {}]   ;;  %s1832_s9 = inlined_call_operand.vmem [shape: f32[1,128], index: 9, kind: input, shape index: {}]   ;;  %s1833_s10 = inlined_call_operand.hbm [shape: bf16[128,128], index: 10, kind: input, shape index: {}]   ;;  %s1834_s11 = inlined_call_operand.vmem [shape: f32[1,128], index: 11, kind: input, shape index: {}]   ;;  %s1835_s12 = inlined_call_operand.hbm [shape: bf16[128,128], index: 12, kind: input, shape index: {}]   ;;  %s1836_s13 = inlined_call_operand.vmem [shape: f32[1,128], index: 13, kind: input, shape index: {}]   ;;  %s1837_s14 = inlined_call_operand.hbm [shape: bf16[16,128], index: 14, kind: output, shape index: {0}]   ;;  %s1838_s15 = inlined_call_operand.hbm [shape: bf16[16,128], index: 15, kind: output, shape index: {1}]  }
   0x1   :  { %22 = vsyncpa [#allocation6], 0 }
   0x2   :  { %23 = vsyncpa [#allocation9], 0 }
   0x3   :  { %24 = vsyncpa [#allocation12], 0 }
   0x4   :  { %25 = vsyncpa [#allocation15], 0 }
   0x5   :  { %26 = vsyncpa [#allocation4], 0 }
   0x6   :  { %27 = vsyncpa [#allocation18], 0  ;;  %s1471_s18 = smov [#allocation5]   ;;  %s1472_s20 = smov [#allocation8]  }
   0x7   :  { %s45_s19 = sshll.u32 %s1471_s18, 4  ;;  %s71_s21 = sshll.u32 %s1472_s20, 4  ;;  %s46_s19 = int_to_ptr.vmem [resolvable:$true] %s45_s19  ;;  %s1565_s21 = int_to_ptr.vmem [resolvable:$true] %s71_s21 }
   0x8   :  { %s1237_s24 = scalar_lea.hbm %s1824_s1, 128 }
   0x9   :  { %p1238_p0 = scmp.ne.s32.totalorder %s1824_s1, %s1237_s24  ;;  %p1241_p1 = scmp.lt.u32.totalorder %s1237_s24, %s1824_s1 }
   0xb   :  { %p1243_p2 = pnand %p1241_p1, %p1238_p0 }
   0xd   :  { %1246 = shalt.err (!%p1243_p2)
}
   0xe   :  { %s1247_s29 = scalar_lea.vmem %s46_s19, 128  ;;  %p1252_p4 = scmp.lt.s32.totalorder %s46_s19, %s46_s19 }
   0xf   :  { %p1248_p3 = scmp.ne.s32.totalorder %s46_s19, %s1247_s29  ;;  %p1253_p5 = scmp.lt.s32.totalorder %s1247_s29, %s1247_s29 }
  0x11   :  { %p1254_p6 = por %p1253_p5, %p1252_p4 }
  0x13   :  { %p1255_p7 = pnand %p1254_p6, %p1248_p3 }
  0x15   :  { %1258 = shalt.err (!%p1255_p7)
}
  0x16   :  { %s1473_s30 = smov 64   ;;  %s1474_s16 = smov 4  }
  0x17   :  { %51 = dma.hbm_to_vmem [thread:$0]  %s1824_s1, 128, %s46_s19, [#allocation6], %s1473_s30, %s1473_s30, %s1474_s16  }
  0x18   :  { %s1259_s23 = scalar_lea.hbm %s1827_s4, 1024 }
  0x19   :  { %p1260_p8 = scmp.ne.s32.totalorder %s1827_s4, %s1259_s23  ;;  %p1263_p9 = scmp.lt.u32.totalorder %s1259_s23, %s1827_s4 }
  0x1b   :  { %p1265_p10 = pnand %p1263_p9, %p1260_p8 }
  0x1d   :  { %1268 = shalt.err (!%p1265_p10)
}
  0x1e   :  { %s1269_s28 = scalar_lea.vmem %s1565_s21, 1024  ;;  %p1274_p12 = scmp.lt.s32.totalorder %s1565_s21, %s1565_s21 }
  0x1f   :  { %p1270_p11 = scmp.ne.s32.totalorder %s1565_s21, %s1269_s28  ;;  %p1275_p13 = scmp.lt.s32.totalorder %s1269_s28, %s1269_s28 }
  0x21   :  { %p1276_p0 = por %p1275_p13, %p1274_p12 }
  0x23   :  { %p1277_p1 = pnand %p1276_p0, %p1270_p11 }
  0x25   :  { %1280 = shalt.err (!%p1277_p1)
}
  0x26   :  { %77 = dma.hbm_to_vmem [thread:$0]  %s1827_s4, 1024, %s1565_s21, [#allocation9], %s1473_s30, %s1473_s30, %s1474_s16  }
  0x27   :  { %s1475_s29 = smov [#allocation11]   ;;  %s1476_s18 = smov [#allocation2]  }
  0x28   :  { %s99_s17 = sshll.u32 %s1475_s29, 4  ;;  %s33_s20 = sshll.u32 %s1476_s18, 4  ;;  %s100_s17 = int_to_ptr.vmem [resolvable:$true] %s99_s17  ;;  %s1602_s20 = int_to_ptr.vmem [resolvable:$true] %s33_s20 }
  0x29   :  { %s1281_s24 = scalar_lea.hbm %s1831_s8, 1024 }
  0x2a   :  { %p1282_p2 = scmp.ne.s32.totalorder %s1831_s8, %s1281_s24  ;;  %p1285_p3 = scmp.lt.u32.totalorder %s1281_s24, %s1831_s8 }
  0x2c   :  { %p1287_p4 = pnand %p1285_p3, %p1282_p2 }
  0x2e   :  { %1290 = shalt.err (!%p1287_p4)
}
  0x2f   :  { %s1291_s4 = scalar_lea.vmem %s100_s17, 1024  ;;  %p1296_p6 = scmp.lt.s32.totalorder %s100_s17, %s100_s17 }
  0x30   :  { %p1292_p5 = scmp.ne.s32.totalorder %s100_s17, %s1291_s4  ;;  %p1297_p7 = scmp.lt.s32.totalorder %s1291_s4, %s1291_s4 }
  0x32   :  { %p1298_p8 = por %p1297_p7, %p1296_p6 }
  0x34   :  { %p1299_p9 = pnand %p1298_p8, %p1292_p5 }
  0x36   :  { %1302 = shalt.err (!%p1299_p9)
}
  0x37   :  { %105 = dma.hbm_to_vmem [thread:$0]  %s1831_s8, 1024, %s100_s17, [#allocation12], %s1473_s30, %s1473_s30, %s1474_s16  }
  0x38   :  { %s1303_s18 = scalar_lea.hbm %s1823_s0, 128 }
  0x39   :  { %p1304_p10 = scmp.ne.s32.totalorder %s1823_s0, %s1303_s18  ;;  %p1307_p11 = scmp.lt.u32.totalorder %s1303_s18, %s1823_s0 }
  0x3b   :  { %p1309_p12 = pnand %p1307_p11, %p1304_p10 }
  0x3d   :  { %1312 = shalt.err (!%p1309_p12)
}
  0x3e   :  { %s1313_s26 = scalar_lea.vmem %s1602_s20, 128  ;;  %p1318_p0 = scmp.lt.s32.totalorder %s1602_s20, %s1602_s20 }
  0x3f   :  { %p1314_p13 = scmp.ne.s32.totalorder %s1602_s20, %s1313_s26  ;;  %p1319_p1 = scmp.lt.s32.totalorder %s1313_s26, %s1313_s26 }
  0x41   :  { %p1320_p2 = por %p1319_p1, %p1318_p0 }
  0x43   :  { %p1321_p3 = pnand %p1320_p2, %p1314_p13 }
  0x45   :  { %1324 = shalt.err (!%p1321_p3)
}
  0x46   :  { %39 = dma.hbm_to_vmem [thread:$0]  %s1823_s0, 128, %s1602_s20, [#allocation3], %s1473_s30, %s1473_s30, %s1474_s16  }
  0x47   :  { %s1477_s27 = smov [#allocation7]   ;;  %s1478_s4 = smov [#allocation10]  }
  0x48   :  { %s57_s28 = sshll.u32 %s1477_s27, 4  ;;  %s85_s21 = sshll.u32 %s1478_s4, 4  ;;  %s58_s28 = int_to_ptr.vmem [resolvable:$true] %s57_s28  ;;  %s1639_s21 = int_to_ptr.vmem [resolvable:$true] %s85_s21 }
  0x49   :  { %s1325_s29 = scalar_lea.hbm %s1825_s2, 1024 }
  0x4a   :  { %p1326_p4 = scmp.ne.s32.totalorder %s1825_s2, %s1325_s29  ;;  %p1329_p5 = scmp.lt.u32.totalorder %s1325_s29, %s1825_s2 }
  0x4c   :  { %p1331_p6 = pnand %p1329_p5, %p1326_p4 }
  0x4e   :  { %1334 = shalt.err (!%p1331_p6)
}
  0x4f   :  { %s1335_s0 = scalar_lea.vmem %s58_s28, 1024  ;;  %p1340_p8 = scmp.lt.s32.totalorder %s58_s28, %s58_s28 }
  0x50   :  { %p1336_p7 = scmp.ne.s32.totalorder %s58_s28, %s1335_s0  ;;  %p1341_p9 = scmp.lt.s32.totalorder %s1335_s0, %s1335_s0 }
  0x52   :  { %p1342_p10 = por %p1341_p9, %p1340_p8 }
  0x54   :  { %p1343_p11 = pnand %p1342_p10, %p1336_p7 }
  0x56   :  { %1346 = shalt.err (!%p1343_p11)
}
  0x57   :  { %63 = dma.hbm_to_vmem [thread:$0]  %s1825_s2, 1024, %s58_s28, [#allocation6], %s1473_s30, %s1473_s30, %s1474_s16  }
  0x58   :  { %s1347_s17 = scalar_lea.hbm %s1829_s6, 1024 }
  0x59   :  { %p1348_p12 = scmp.ne.s32.totalorder %s1829_s6, %s1347_s17  ;;  %p1351_p13 = scmp.lt.u32.totalorder %s1347_s17, %s1829_s6 }
  0x5b   :  { %p1353_p0 = pnand %p1351_p13, %p1348_p12 }
  0x5d   :  { %1356 = shalt.err (!%p1353_p0)
}
  0x5e   :  { %s1357_s29 = scalar_lea.vmem %s1639_s21, 1024  ;;  %p1362_p2 = scmp.lt.s32.totalorder %s1639_s21, %s1639_s21 }
  0x5f   :  { %p1358_p1 = scmp.ne.s32.totalorder %s1639_s21, %s1357_s29  ;;  %p1363_p3 = scmp.lt.s32.totalorder %s1357_s29, %s1357_s29 }
  0x61   :  { %p1364_p4 = por %p1363_p3, %p1362_p2 }
  0x63   :  { %p1365_p5 = pnand %p1364_p4, %p1358_p1 }
  0x65   :  { %1368 = shalt.err (!%p1365_p5)
}
  0x66   :  { %91 = dma.hbm_to_vmem [thread:$0]  %s1829_s6, 1024, %s1639_s21, [#allocation9], %s1473_s30, %s1473_s30, %s1474_s16  }
  0x67   :  { %s1479_s18 = smov [#allocation13]   ;;  %s1480_s23 = smov [#allocation14]  }
  0x68   :  { %s113_s22 = sshll.u32 %s1479_s18, 4  ;;  %s127_s24 = sshll.u32 %s1480_s23, 4  ;;  %s114_s22 = int_to_ptr.vmem [resolvable:$true] %s113_s22  ;;  %s1676_s24 = int_to_ptr.vmem [resolvable:$true] %s127_s24 }
  0x69   :  { %s1369_s25 = scalar_lea.hbm %s1833_s10, 1024 }
  0x6a   :  { %p1370_p6 = scmp.ne.s32.totalorder %s1833_s10, %s1369_s25  ;;  %p1373_p7 = scmp.lt.u32.totalorder %s1369_s25, %s1833_s10 }
  0x6c   :  { %p1375_p8 = pnand %p1373_p7, %p1370_p6 }
  0x6e   :  { %1378 = shalt.err (!%p1375_p8)
}
  0x6f   :  { %s1379_s6 = scalar_lea.vmem %s114_s22, 1024  ;;  %p1384_p10 = scmp.lt.s32.totalorder %s114_s22, %s114_s22 }
  0x70   :  { %p1380_p9 = scmp.ne.s32.totalorder %s114_s22, %s1379_s6  ;;  %p1385_p11 = scmp.lt.s32.totalorder %s1379_s6, %s1379_s6 }
  0x72   :  { %p1386_p12 = por %p1385_p11, %p1384_p10 }
  0x74   :  { %p1387_p13 = pnand %p1386_p12, %p1380_p9 }
  0x76   :  { %1390 = shalt.err (!%p1387_p13)
}
  0x77   :  { %119 = dma.hbm_to_vmem [thread:$0]  %s1833_s10, 1024, %s114_s22, [#allocation12], %s1473_s30, %s1473_s30, %s1474_s16  }
  0x78   :  { %s1391_s29 = scalar_lea.hbm %s1835_s12, 1024 }
  0x79   :  { %p1392_p0 = scmp.ne.s32.totalorder %s1835_s12, %s1391_s29  ;;  %p1395_p1 = scmp.lt.u32.totalorder %s1391_s29, %s1835_s12 }
  0x7b   :  { %p1397_p2 = pnand %p1395_p1, %p1392_p0 }
  0x7d   :  { %1400 = shalt.err (!%p1397_p2)
}
  0x7e   :  { %s1401_s0 = scalar_lea.vmem %s1676_s24, 1024  ;;  %p1406_p4 = scmp.lt.s32.totalorder %s1676_s24, %s1676_s24 }
  0x7f   :  { %p1402_p3 = scmp.ne.s32.totalorder %s1676_s24, %s1401_s0  ;;  %p1407_p5 = scmp.lt.s32.totalorder %s1401_s0, %s1401_s0 }
  0x81   :  { %p1408_p6 = por %p1407_p5, %p1406_p4 }
  0x83   :  { %p1409_p7 = pnand %p1408_p6, %p1402_p3 }
  0x85   :  { %1412 = shalt.err (!%p1409_p7)
}
  0x86   :  { %133 = dma.hbm_to_vmem [thread:$0]  %s1835_s12, 1024, %s1676_s24, [#allocation15], %s1473_s30, %s1473_s30, %s1474_s16  }
  0x87   :  { %1457 = dma.done.wait [#allocation3], 128  }
  0x88   :  { %1458 = vsyncadd [#allocation3], 4294967168 }
  0x89   :  { %1459 = dma.done.wait [#allocation6], 1152  }
  0x8a   :  { %1460 = vsyncadd [#allocation6], 4294966144 }
  0x8b   :  { %1461 = dma.done.wait [#allocation9], 2048  }
  0x8c   :  { %1462 = vsyncadd [#allocation9], 4294965248 }
  0x8d   :  { %1463 = dma.done.wait [#allocation12], 2048  }
  0x8e   :  { %1464 = vsyncadd [#allocation12], 4294965248 }
  0x8f   :  { %1465 = dma.done.wait [#allocation15], 1024  }
  0x90   :  { %1466 = vsyncadd [#allocation15], 4294966272  ;;  %v1481_v0 = vmov 0.0   ;;  %vm1482_vm0 = vmmov 0   ;;  %v1188_v1 = vld [vmem:[#allocation7] sm:$0xff]   ;;  %v1189_v2 = vld [vmem:[#allocation7 + $0x8] sm:$0xff]  }
  0x91   :  { %1054 = vmatprep.subr.bf16.mxu0 %v1481_v0  ;;  %1070 = vmatprep.mubr.msk.bf16.mxu0 %vm1482_vm0, %v1481_v0  ;;  %v1190_v3 = vld [vmem:[#allocation7 + $0x10] sm:$0xff]   ;;  %v1197_v4 = vld [vmem:[#allocation8] sm:$0xff]   ;;  %v1191_v5 = vld [vmem:[#allocation7 + $0x18] sm:$0xff]  }
  0x92   :  { %1074 = vmatprep.subr.bf16.mxu1 %v1481_v0  ;;  %1090 = vmatprep.mubr.msk.bf16.mxu1 %vm1482_vm0, %v1481_v0  ;;  %v1198_v6 = vld [vmem:[#allocation8 + $0x8] sm:$0xff]   ;;  %v1192_v7 = vld [vmem:[#allocation7 + $0x20] sm:$0xff]   ;;  %v1199_v8 = vld [vmem:[#allocation8 + $0x10] sm:$0xff]  }
  0x93   :  { %1055 = vmatpush3.bf16.msra.mxu0 %v1188_v1  ;;  %1075 = vmatpush3.bf16.msra.mxu1 %v1197_v4  ;;  %v1193_v9 = vld [vmem:[#allocation7 + $0x28] sm:$0xff]   ;;  %v1200_v10 = vld [vmem:[#allocation8 + $0x18] sm:$0xff]   ;;  %v1194_v11 = vld [vmem:[#allocation7 + $0x30] sm:$0xff]  }
  0x94   :  { %1056 = vmatprep.subr.bf16.mxu0 %v1481_v0  ;;  %1076 = vmatprep.subr.bf16.mxu1 %v1481_v0  ;;  %v1201_v12 = vld [vmem:[#allocation8 + $0x20] sm:$0xff]   ;;  %v1195_v13 = vld [vmem:[#allocation7 + $0x38] sm:$0xff]   ;;  %v1202_v14 = vld [vmem:[#allocation8 + $0x28] sm:$0xff]  }
  0x95   :  { %v1196_v15 = vld [vmem:[#allocation2] sm:$0xff]   ;;  %v1204_v17 = vld [vmem:[#allocation8 + $0x38] sm:$0xff]   ;;  %v1205_v18 = vld [vmem:[#allocation10] sm:$0xff]  }
  0x96   :  { %v1203_v16 = vld [vmem:[#allocation8 + $0x30] sm:$0xff]   ;;  %v1206_v19 = vld [vmem:[#allocation10 + $0x8] sm:$0xff]   ;;  %v1208_v21 = vld [vmem:[#allocation10 + $0x18] sm:$0xff]  }
  0x97   :  { %1057 = vmatpush3.bf16.msra.mxu0 %v1189_v2  ;;  %1077 = vmatpush3.bf16.msra.mxu1 %v1198_v6  ;;  %v1207_v20 = vld [vmem:[#allocation10 + $0x10] sm:$0xff]   ;;  %v1209_v22 = vld [vmem:[#allocation10 + $0x20] sm:$0xff]   ;;  %v1210_v23 = vld [vmem:[#allocation10 + $0x28] sm:$0xff]  }
  0x98   :  { %1058 = vmatprep.subr.bf16.mxu0 %v1481_v0  ;;  %1078 = vmatprep.subr.bf16.mxu1 %v1481_v0  ;;  %v923_v24 = vld [vmem:[%s1826_s3] ss:$0 sm:$0xff]  ;;  %v1212_v35 = vld [vmem:[#allocation10 + $0x38] sm:$0xff]   ;;  %v1213_v46 = vld [vmem:[#allocation11] sm:$0xff]  }
  0x99   :  { %v1211_v34 = vld [vmem:[#allocation10 + $0x30] sm:$0xff]   ;;  %v1214_v47 = vld [vmem:[#allocation11 + $0x8] sm:$0xff]   ;;  %v1216_v49 = vld [vmem:[#allocation11 + $0x18] sm:$0xff]  }
  0x9a   :  { %v933_v36 = vld [vmem:[%s1828_s5] ss:$0 sm:$0xff]  ;;  %v1217_v50 = vld [vmem:[#allocation11 + $0x20] sm:$0xff]   ;;  %v1218_v51 = vld [vmem:[#allocation11 + $0x28] sm:$0xff]  }
  0x9b   :  { %1059 = vmatpush3.bf16.msra.mxu0 %v1190_v3  ;;  %1079 = vmatpush3.bf16.msra.mxu1 %v1199_v8  ;;  %v1215_v48 = vld [vmem:[#allocation11 + $0x10] sm:$0xff]   ;;  %v1220_v53 = vld [vmem:[#allocation11 + $0x38] sm:$0xff]   ;;  %v1221_v56 = vld [vmem:[#allocation13] sm:$0xff]  }
  0x9c   :  { %1060 = vmatprep.subr.bf16.mxu0 %v1481_v0  ;;  %1080 = vmatprep.subr.bf16.mxu1 %v1481_v0  ;;  %v1219_v52 = vld [vmem:[#allocation11 + $0x30] sm:$0xff]   ;;  %v1222_v60 = vld [vmem:[#allocation13 + $0x8] sm:$0xff]   ;;  %v1224_v2 = vld [vmem:[#allocation13 + $0x18] sm:$0xff]  }
  0x9d   :  { %v942_v54 = vld [vmem:[%s1830_s7] ss:$0 sm:$0xff]  ;;  %v1225_v3 = vld [vmem:[#allocation13 + $0x20] sm:$0xff]   ;;  %v1226_v4 = vld [vmem:[#allocation13 + $0x28] sm:$0xff]  }
  0x9e   :  { %v1223_v1 = vld [vmem:[#allocation13 + $0x10] sm:$0xff]  }
  0x9f   :  { %1061 = vmatpush3.bf16.msra.mxu0 %v1191_v5  ;;  %1081 = vmatpush3.bf16.msra.mxu1 %v1200_v10  ;;  %v987_v5 = vld [vmem:[#allocation5] sm:$0xff]  }
  0xa0   :  { %1062 = vmatprep.subr.bf16.mxu0 %v1481_v0  ;;  %1082 = vmatprep.subr.bf16.mxu1 %v1481_v0  ;;  %v988_v6 = vunpack.c.l.bf16 %v987_v5  ;;  %v989_v8 = vunpack.c.h.bf16 %v987_v5 }
  0xa3   :  { %1063 = vmatpush3.bf16.msra.mxu0 %v1192_v7  ;;  %1083 = vmatpush3.bf16.msra.mxu1 %v1201_v12 }
  0xa4   :  { %1064 = vmatprep.subr.bf16.mxu0 %v1481_v0  ;;  %1084 = vmatprep.subr.bf16.mxu1 %v1481_v0 }
  0xa7   :  { %1065 = vmatpush3.bf16.msra.mxu0 %v1193_v9  ;;  %1085 = vmatpush3.bf16.msra.mxu1 %v1202_v14 }
  0xa8   :  { %1066 = vmatprep.subr.bf16.mxu0 %v1481_v0  ;;  %1086 = vmatprep.subr.bf16.mxu1 %v1481_v0 }
  0xab   :  { %1067 = vmatpush3.bf16.msra.mxu0 %v1194_v11  ;;  %1087 = vmatpush3.bf16.msra.mxu1 %v1203_v16  ;;  %v1228_v16 = vld [vmem:[#allocation13 + $0x38] sm:$0xff]  }
  0xac   :  { %1068 = vmatprep.subr.bf16.mxu0 %v1481_v0  ;;  %1088 = vmatprep.subr.bf16.mxu1 %v1481_v0 }
  0xaf   :  { %1069 = vmatpush3.bf16.msra.mxu0 %v1195_v13  ;;  %1089 = vmatpush3.bf16.msra.mxu1 %v1204_v17  ;;  %v1229_v17 = vld [vmem:[#allocation14] sm:$0xff]  }
  0xb0   :  { %1094 = vmatprep.subr.bf16.mxu0 %v1481_v0  ;;  %1114 = vmatprep.subr.bf16.mxu1 %v1481_v0 }
  0xb2   :  { %1071 = vmatmul.mubr.bf16.vlgmr.msra.gmra.mrb[0].mxu0 %v1196_v15  ;;  %v1227_v15 = vld [vmem:[#allocation13 + $0x30] sm:$0xff]  }
  0xb3   :  { %1110 = vmatprep.mubr.msk.bf16.mxu0 %vm1482_vm0, %v1481_v0  ;;  %1095 = vmatpush3.bf16.msra.mxu0 %v1205_v18  ;;  %v1230_v18 = vld [vmem:[#allocation14 + $0x8] sm:$0xff]  }
  0xb4   :  { %1096 = vmatprep.subr.bf16.mxu0 %v1481_v0 }
  0xb7   :  { %1097 = vmatpush3.bf16.msra.mxu0 %v1206_v19  ;;  %v1231_v19 = vld [vmem:[#allocation14 + $0x10] sm:$0xff]  }
  0xb8   :  { %1098 = vmatprep.subr.bf16.mxu0 %v1481_v0 }
  0xbb   :  { %1099 = vmatpush3.bf16.msra.mxu0 %v1207_v20  ;;  %v1232_v20 = vld [vmem:[#allocation14 + $0x18] sm:$0xff]  }
  0xbc   :  { %1100 = vmatprep.subr.bf16.mxu0 %v1481_v0 }
  0xbf   :  { %1101 = vmatpush3.bf16.msra.mxu0 %v1208_v21  ;;  %v1233_v21 = vld [vmem:[#allocation14 + $0x20] sm:$0xff]  }
  0xc0   :  { %1102 = vmatprep.subr.bf16.mxu0 %v1481_v0 }
  0xc3   :  { %1103 = vmatpush3.bf16.msra.mxu0 %v1209_v22  ;;  %v1234_v22 = vld [vmem:[#allocation14 + $0x28] sm:$0xff]  }
  0xc4   :  { %1104 = vmatprep.subr.bf16.mxu0 %v1481_v0 }
  0xc7   :  { %1105 = vmatpush3.bf16.msra.mxu0 %v1210_v23  ;;  %v951_v23 = vld [vmem:[%s1832_s9] ss:$0 sm:$0xff]  ;;  %s1483_s9 = smov [#allocation17]  }
  0xc8   :  { %1106 = vmatprep.subr.bf16.mxu0 %v1481_v0  ;;  %s903_s27 = sshll.u32 %s1483_s9, 4  ;;  %s904_s27 = int_to_ptr.vmem [resolvable:$true] %s903_s27 }
  0xc9   :  { %s1413_s6 = scalar_lea.vmem %s904_s27, 128  ;;  %p1418_p9 = scmp.lt.s32.totalorder %s904_s27, %s904_s27 }
  0xca   :  { %p1414_p8 = scmp.ne.s32.totalorder %s904_s27, %s1413_s6  ;;  %p1419_p10 = scmp.lt.s32.totalorder %s1413_s6, %s1413_s6 }
  0xcb   :  { %1107 = vmatpush3.bf16.msra.mxu0 %v1211_v34  ;;  %v1236_v34 = vld [vmem:[#allocation14 + $0x38] sm:$0xff]  }
  0xcc   :  { %1108 = vmatprep.subr.bf16.mxu0 %v1481_v0  ;;  %p1420_p11 = por %p1419_p10, %p1418_p9 }
  0xce   :  { %p1421_p12 = pnand %p1420_p11, %p1414_p8 }
  0xcf   :  { %1109 = vmatpush3.bf16.msra.mxu0 %v1212_v35  ;;  %v960_v35 = vld [vmem:[%s1834_s11] ss:$0 sm:$0xff] }
  0xd0   :  { %1134 = vmatprep.subr.bf16.mxu0 %v1481_v0 }
 0x185   :  { %v274_v25 = vpop.f32.mrb[0].mxu0 }
 0x186   :  { %v275_v26 = vadd.f32 %v923_v24, %v274_v25  ;;  %v1072_v27 = vpop.f32.mrb[1].mxu0 }
 0x187   :  { %v277_v28 = vpop.f32.mrb[2].mxu0 }
 0x188   :  { %v278_v29 = vadd.f32 %v923_v24, %v277_v28  ;;  %v1073_v30 = vpop.f32.mrb[3].mxu0  ;;  %v281_v31 = vmax.f32 %v275_v26, 0.0 }
 0x18a   :  { %v282_v32 = vmax.f32 %v278_v29, 0.0 }
 0x18c   :  { %v283_v33 = vpack.c.bf16 %v282_v32, %v281_v31 }
 0x18e   :  { %1091 = vmatmul.mubr.bf16.vlgmr.msra.gmra.mrb[0].mxu1 %v283_v33  ;;  %v1235_v33 = vld [vmem:[#allocation14 + $0x30] sm:$0xff]  }
 0x18f   :  { %1130 = vmatprep.mubr.msk.bf16.mxu1 %vm1482_vm0, %v1481_v0  ;;  %1115 = vmatpush3.bf16.msra.mxu1 %v1213_v46 }
 0x190   :  { %1116 = vmatprep.subr.bf16.mxu1 %v1481_v0 }
 0x193   :  { %1117 = vmatpush3.bf16.msra.mxu1 %v1214_v47 }
 0x194   :  { %1118 = vmatprep.subr.bf16.mxu1 %v1481_v0 }
 0x197   :  { %1119 = vmatpush3.bf16.msra.mxu1 %v1215_v48 }
 0x198   :  { %1120 = vmatprep.subr.bf16.mxu1 %v1481_v0 }
 0x19b   :  { %1121 = vmatpush3.bf16.msra.mxu1 %v1216_v49 }
 0x19c   :  { %1122 = vmatprep.subr.bf16.mxu1 %v1481_v0 }
 0x19f   :  { %1123 = vmatpush3.bf16.msra.mxu1 %v1217_v50 }
 0x1a0   :  { %1124 = vmatprep.subr.bf16.mxu1 %v1481_v0 }
 0x1a3   :  { %1125 = vmatpush3.bf16.msra.mxu1 %v1218_v51 }
 0x1a4   :  { %1126 = vmatprep.subr.bf16.mxu1 %v1481_v0 }
 0x1a7   :  { %1127 = vmatpush3.bf16.msra.mxu1 %v1219_v52 }
 0x1a8   :  { %1128 = vmatprep.subr.bf16.mxu1 %v1481_v0 }
 0x1ab   :  { %1129 = vmatpush3.bf16.msra.mxu1 %v1220_v53 }
 0x1ac   :  { %1154 = vmatprep.subr.bf16.mxu1 %v1481_v0 }
 0x261   :  { %v389_v37 = vpop.f32.mrb[0].mxu1 }
 0x262   :  { %v390_v38 = vadd.f32 %v933_v36, %v389_v37  ;;  %v1092_v39 = vpop.f32.mrb[1].mxu1 }
 0x263   :  { %v392_v40 = vpop.f32.mrb[2].mxu1 }
 0x264   :  { %v393_v41 = vadd.f32 %v933_v36, %v392_v40  ;;  %v1093_v42 = vpop.f32.mrb[3].mxu1  ;;  %v396_v43 = vmax.f32 %v390_v38, 0.0 }
 0x266   :  { %v397_v44 = vmax.f32 %v393_v41, 0.0 }
 0x268   :  { %v398_v45 = vpack.c.bf16 %v397_v44, %v396_v43 }
 0x26a   :  { %1111 = vmatmul.mubr.bf16.vlgmr.msra.gmra.mrb[4].mxu0 %v398_v45 }
 0x26b   :  { %1150 = vmatprep.mubr.msk.bf16.mxu0 %vm1482_vm0, %v1481_v0  ;;  %1135 = vmatpush3.bf16.msra.mxu0 %v1221_v56 }
 0x26c   :  { %1136 = vmatprep.subr.bf16.mxu0 %v1481_v0 }
 0x26f   :  { %1137 = vmatpush3.bf16.msra.mxu0 %v1222_v60 }
 0x270   :  { %1138 = vmatprep.subr.bf16.mxu0 %v1481_v0 }
 0x273   :  { %1139 = vmatpush3.bf16.msra.mxu0 %v1223_v1 }
 0x274   :  { %1140 = vmatprep.subr.bf16.mxu0 %v1481_v0 }
 0x277   :  { %1141 = vmatpush3.bf16.msra.mxu0 %v1224_v2 }
 0x278   :  { %1142 = vmatprep.subr.bf16.mxu0 %v1481_v0 }
 0x27b   :  { %1143 = vmatpush3.bf16.msra.mxu0 %v1225_v3 }
 0x27c   :  { %1144 = vmatprep.subr.bf16.mxu0 %v1481_v0 }
 0x27f   :  { %1145 = vmatpush3.bf16.msra.mxu0 %v1226_v4 }
 0x280   :  { %1146 = vmatprep.subr.bf16.mxu0 %v1481_v0 }
 0x283   :  { %1147 = vmatpush3.bf16.msra.mxu0 %v1227_v15 }
 0x284   :  { %1148 = vmatprep.subr.bf16.mxu0 %v1481_v0 }
 0x287   :  { %1149 = vmatpush3.bf16.msra.mxu0 %v1228_v16 }
 0x33d   :  { %v504_v55 = vpop.f32.mrb[4].mxu0 }
 0x33e   :  { %v505_v57 = vadd.f32 %v942_v54, %v504_v55  ;;  %v1112_v58 = vpop.f32.mrb[5].mxu0 }
 0x33f   :  { %v507_v59 = vpop.f32.mrb[6].mxu0 }
 0x340   :  { %v508_v61 = vadd.f32 %v942_v54, %v507_v59  ;;  %515 = vrot.lane.b32.xlu0 %v505_v57, %s1473_s30  ;;  %v1113_v62 = vpop.f32.mrb[7].mxu0 }
 0x342   :  { %v998_v63 = vpack.c.bf16 %v508_v61, %v505_v57 }
 0x344   :  { %517 = vrot.lane.b32.xlu0 %v508_v61, %s1473_s30  ;;  %999 = vst [vmem:[#allocation17] sm:$0xff] %v998_v63  }
 0x3b2   :  { %v516_v7 = vpop.permute.xlu0 %515 }
 0x3b3   :  { %v519_v9 = vmul.f32 %v988_v6, %v516_v7 }
 0x3b5   :  { %v521_v12 = vadd.f32 %v519_v9, %v505_v57 }
 0x3b6   :  { %v518_v10 = vpop.permute.xlu0 %517 }
 0x3b7   :  { %v520_v11 = vmul.f32 %v989_v8, %v518_v10 }
 0x3b9   :  { %v522_v13 = vadd.f32 %v520_v11, %v508_v61 }
 0x3bb   :  { %v523_v14 = vpack.c.bf16 %v522_v13, %v521_v12 }
 0x3bd   :  { %1131 = vmatmul.mubr.bf16.vlgmr.msra.gmra.mrb[4].mxu1 %v523_v14 }
 0x3be   :  { %1170 = vmatprep.mubr.msk.bf16.mxu1 %vm1482_vm0, %v1481_v0  ;;  %1155 = vmatpush3.bf16.msra.mxu1 %v1229_v17 }
 0x3bf   :  { %1156 = vmatprep.subr.bf16.mxu1 %v1481_v0 }
 0x3c2   :  { %1157 = vmatpush3.bf16.msra.mxu1 %v1230_v18 }
 0x3c3   :  { %1158 = vmatprep.subr.bf16.mxu1 %v1481_v0 }
 0x3c6   :  { %1159 = vmatpush3.bf16.msra.mxu1 %v1231_v19 }
 0x3c7   :  { %1160 = vmatprep.subr.bf16.mxu1 %v1481_v0 }
 0x3ca   :  { %1161 = vmatpush3.bf16.msra.mxu1 %v1232_v20 }
 0x3cb   :  { %1162 = vmatprep.subr.bf16.mxu1 %v1481_v0 }
 0x3ce   :  { %1163 = vmatpush3.bf16.msra.mxu1 %v1233_v21 }
 0x3cf   :  { %1164 = vmatprep.subr.bf16.mxu1 %v1481_v0 }
 0x3d2   :  { %1165 = vmatpush3.bf16.msra.mxu1 %v1234_v22 }
 0x3d3   :  { %1166 = vmatprep.subr.bf16.mxu1 %v1481_v0 }
 0x3d6   :  { %1167 = vmatpush3.bf16.msra.mxu1 %v1235_v33 }
 0x3d7   :  { %1168 = vmatprep.subr.bf16.mxu1 %v1481_v0 }
 0x3da   :  { %1169 = vmatpush3.bf16.msra.mxu1 %v1236_v34 }
 0x490   :  { %v629_v24 = vpop.f32.mrb[4].mxu1 }
 0x491   :  { %v630_v25 = vadd.f32 %v951_v23, %v629_v24  ;;  %v1132_v26 = vpop.f32.mrb[5].mxu1 }
 0x492   :  { %v632_v27 = vpop.f32.mrb[6].mxu1 }
 0x493   :  { %v633_v28 = vadd.f32 %v951_v23, %v632_v27  ;;  %v1133_v29 = vpop.f32.mrb[7].mxu1  ;;  %v636_v30 = vmax.f32 %v630_v25, 0.0 }
 0x495   :  { %v637_v31 = vmax.f32 %v633_v28, 0.0 }
 0x497   :  { %v638_v32 = vpack.c.bf16 %v637_v31, %v636_v30 }
 0x499   :  { %1151 = vmatmul.mubr.bf16.vlgmr.msra.gmra.mrb[8].mxu0 %v638_v32 }
 0x56c   :  { %v744_v36 = vpop.f32.mrb[8].mxu0 }
 0x56d   :  { %v745_v37 = vadd.f32 %v960_v35, %v744_v36  ;;  %v1152_v38 = vpop.f32.mrb[9].mxu0 }
 0x56e   :  { %v747_v39 = vpop.f32.mrb[10].mxu0 }
 0x56f   :  { %v748_v40 = vadd.f32 %v960_v35, %v747_v39  ;;  %v1153_v41 = vpop.f32.mrb[11].mxu0  ;;  %v751_v42 = vmax.f32 %v745_v37, 0.0 }
 0x571   :  { %v752_v43 = vmax.f32 %v748_v40, 0.0 }
 0x573   :  { %v753_v44 = vpack.c.bf16 %v752_v43, %v751_v42 }
 0x575   :  { %1171 = vmatmul.mubr.bf16.vlgmr.msra.gmra.mrb[8].mxu1 %v753_v44 }
 0x576   :  { %1424 = shalt.err (!%p1421_p12)
}
 0x577   :  { %s1425_s4 = scalar_lea.hbm %s1838_s15, 128 }
 0x578   :  { %p1426_p13 = scmp.ne.s32.totalorder %s1838_s15, %s1425_s4  ;;  %p1429_p0 = scmp.lt.u32.totalorder %s1425_s4, %s1838_s15 }
 0x57a   :  { %p1431_p1 = pnand %p1429_p0, %p1426_p13 }
 0x57c   :  { %1434 = shalt.err (!%p1431_p1)
}
 0x57d   :  { %909 = dma.vmem_to_hbm [thread:$0]  %s904_s27, 128, %s1838_s15, [#allocation18], %s1473_s30, %s1473_s30, %s1474_s16  }
 0x57e   :  { %v969_v0 = vld [vmem:[%s1836_s13] ss:$0 sm:$0xff]  ;;  %s1484_s10 = smov [#allocation16]  }
 0x57f   :  { %s891_s22 = sshll.u32 %s1484_s10, 4  ;;  %s892_s22 = int_to_ptr.vmem [resolvable:$true] %s891_s22 }
 0x580   :  { %s1435_s12 = scalar_lea.vmem %s892_s22, 128  ;;  %p1440_p3 = scmp.lt.s32.totalorder %s892_s22, %s892_s22 }
 0x581   :  { %p1436_p2 = scmp.ne.s32.totalorder %s892_s22, %s1435_s12  ;;  %p1441_p4 = scmp.lt.s32.totalorder %s1435_s12, %s1435_s12 }
 0x583   :  { %p1442_p5 = por %p1441_p4, %p1440_p3 }
 0x585   :  { %p1443_p6 = pnand %p1442_p5, %p1436_p2 }
 0x648   :  { %v859_v45 = vpop.f32.mrb[8].mxu1 }
 0x649   :  { %v1172_v46 = vpop.f32.mrb[9].mxu1  ;;  %v860_v48 = vadd.f32 %v969_v0, %v859_v45 }
 0x64a   :  { %v862_v47 = vpop.f32.mrb[10].mxu1 }
 0x64b   :  { %v863_v49 = vadd.f32 %v969_v0, %v862_v47  ;;  %v1173_v50 = vpop.f32.mrb[11].mxu1 }
 0x64d   :  { %v993_v51 = vpack.c.bf16 %v863_v49, %v860_v48 }
 0x64f   :  { %994 = vst [vmem:[#allocation16] sm:$0xff] %v993_v51  }
 0x650   :  { %1446 = shalt.err (!%p1443_p6)
}
 0x651   :  { %s1447_s24 = scalar_lea.hbm %s1837_s14, 128 }
 0x652   :  { %p1448_p7 = scmp.ne.s32.totalorder %s1837_s14, %s1447_s24  ;;  %p1451_p8 = scmp.lt.u32.totalorder %s1447_s24, %s1837_s14 }
 0x654   :  { %p1453_p9 = pnand %p1451_p8, %p1448_p7 }
 0x656   :  { %1456 = shalt.err (!%p1453_p9)
}
 0x657   :  { %897 = dma.vmem_to_hbm [thread:$0]  %s892_s22, 128, %s1837_s14, [#allocation4], %s1473_s30, %s1473_s30, %s1474_s16  }
 0x658   :  { %1467 = dma.done.wait [#allocation4], 128  }
 0x659   :  { %1468 = vsyncadd [#allocation4], 4294967168 }
 0x65a   :  { %1469 = dma.done.wait [#allocation18], 128  }
 0x65b   :  { %1470 = vsyncadd [#allocation18], 4294967168 }
 0x65c   :  { %916 = vsyncpa [#allocation3], 1 }
 0x65d   :  { %917 = vsyncpa [#allocation6], 1 }
 0x65e   :  { %918 = vsyncpa [#allocation9], 1 }
 0x65f   :  { %919 = vsyncpa [#allocation12], 1 }
 0x660   :  { %920 = vsyncpa [#allocation15], 1 }
 0x661   :  { %921 = vsyncpa [#allocation4], 1 }
 0x662   :  { %922 = vsyncpa [#allocation18], 1 }

</bundles_post_ra>
